<compile_context>
chip_gen: v5e
topology: v5e:2x2
jax: 0.10.0
libtpu: 0.0.40
codegen_flags: <defaults>
</compile_context>

<pallas_src>
import jax
import jax.numpy as jnp
from jax.experimental import pallas as pl
from jax.experimental.pallas import tpu as pltpu

_BN_EPS = 1e-5
_VMEM_LIMIT = 48 * 1024 * 1024        # safe on v5e/v6e (128 MiB) and v7x (64 MiB)
_XW_RESIDENT_BYTES = 8 * 1024 * 1024  # keep XW fully VMEM-resident when <= 8 MiB


def _round_up(x, m):
    return (x + m - 1) // m * m


def _plan_tiles(n):
    """Padded node count + streaming tiles for H = A_hat @ XW.

    Large tiles (tm up to 1024, tk up to 2048) keep the grid-step count low
    (~0.35 us per step overhead) while the double-buffered bf16 A_hat tile
    stays <= 8 MiB; g_m >= 2 whenever n permits so the "parallel" row axis
    can split across the two v7x TensorCores.
    """
    n128 = _round_up(max(n, 1), 128)
    if n128 <= 256:
        tm, n_pad = 128, n128
        tk = n_pad
    elif n128 <= 2048:
        tm = _round_up(n128 // 2, 128)   # exactly two row tiles
        n_pad = 2 * tm
        tk = n_pad
    else:
        tm, tk = 1024, 2048
        n_pad = _round_up(n, 2048)       # divisible by both tm and tk
    return n_pad, tm, tk


# --------------------------------------------------------------------------
# Kernel 1: tiled H = A_hat @ XW (bf16 out) + fused per-row-tile BN statistics
# --------------------------------------------------------------------------
def _aggregate(adj, xw, *, tm, tk):
    n_pad, f_pad = xw.shape
    g_m, g_k = n_pad // tm, n_pad // tk
    xw_resident = (n_pad * f_pad * 2 <= _XW_RESIDENT_BYTES) or (g_k == 1)

    def kernel(adj_ref, xw_ref, h_ref, stats_ref, acc_ref):
        # program_id is only read at the kernel top level (never inside a
        # pl.when body) -- required for clean lowering.
        k = pl.program_id(1)

        @pl.when(k == 0)
        def _init():
            acc_ref[...] = jnp.zeros_like(acc_ref)

        if xw_resident and g_k > 1:
            xw_blk = xw_ref[pl.ds(k * tk, tk), :]
        else:
            xw_blk = xw_ref[...]

        # bf16 x bf16 -> f32 accumulate on the MXU, accumulator resident in VMEM
        acc_ref[...] += jnp.dot(adj_ref[...], xw_blk,
                                preferred_element_type=jnp.float32)

        @pl.when(k == g_k - 1)
        def _finalize():
            acc = acc_ref[...]
            h_ref[...] = acc.astype(h_ref.dtype)
            # Padded rows of A_hat are all-zero => padded rows of H are exactly
            # zero, so unmasked sums equal sums over valid rows (no iota mask).
            stats_ref[0:1, :] = jnp.sum(acc, axis=0, keepdims=True)
            stats_ref[1:2, :] = jnp.sum(acc * acc, axis=0, keepdims=True)

    if xw_resident:
        xw_spec = pl.BlockSpec((n_pad, f_pad), lambda i, k: (0, 0))  # fetched once
    else:
        xw_spec = pl.BlockSpec((tk, f_pad), lambda i, k: (k, 0))

    return pl.pallas_call(
        kernel,
        out_shape=(
            jax.ShapeDtypeStruct((n_pad, f_pad), jnp.bfloat16),    # H (bf16)
            jax.ShapeDtypeStruct((g_m * 8, f_pad), jnp.float32),   # partial stats
        ),
        grid=(g_m, g_k),
        in_specs=[
            pl.BlockSpec((tm, tk), lambda i, k: (i, k)),           # A_hat tile
            xw_spec,                                               # XW
        ],
        out_specs=(
            pl.BlockSpec((tm, f_pad), lambda i, k: (i, 0)),
            pl.BlockSpec((8, f_pad), lambda i, k: (i, 0)),
        ),
        scratch_shapes=[pltpu.VMEM((tm, f_pad), jnp.float32)],     # f32 accumulator
        compiler_params=pltpu.CompilerParams(
            dimension_semantics=("parallel", "arbitrary"),
            vmem_limit_bytes=_VMEM_LIMIT),
    )(adj, xw)


# --------------------------------------------------------------------------
# Kernel 2: fused BatchNorm (folded) + PReLU + next layer's hoisted X @ W_next
# --------------------------------------------------------------------------
def _bn_prelu_matmul(h, fold, w_next, *, tm):
    n_pad, f_pad = h.shape
    f_next_pad = w_next.shape[1]
    g_m = n_pad // tm

    def kernel(h_ref, p_ref, w_ref, o_ref):
        p = p_ref[...]                       # row0=scale, row1=shift, row2=alpha
        z = h_ref[...].astype(jnp.float32) * p[0:1, :] + p[1:2, :]
        a = jnp.where(z > 0.0, z, z * p[2:3, :])
        o_ref[...] = jnp.dot(a.astype(jnp.bfloat16), w_ref[...],
                             preferred_element_type=jnp.float32).astype(o_ref.dtype)

    return pl.pallas_call(
        kernel,
        out_shape=jax.ShapeDtypeStruct((n_pad, f_next_pad), jnp.bfloat16),
        grid=(g_m,),
        in_specs=[
            pl.BlockSpec((tm, f_pad), lambda i: (i, 0)),
            pl.BlockSpec((8, f_pad), lambda i: (0, 0)),            # folded params
            pl.BlockSpec((f_pad, f_next_pad), lambda i: (0, 0)),   # resident W_next
        ],
        out_specs=pl.BlockSpec((tm, f_next_pad), lambda i: (i, 0)),
        compiler_params=pltpu.CompilerParams(
            dimension_semantics=("parallel",),
            vmem_limit_bytes=_VMEM_LIMIT),
    )(h, fold, w_next)


# --------------------------------------------------------------------------
# Kernel 3: last layer's BatchNorm (folded) + PReLU, f32 output
# --------------------------------------------------------------------------
def _bn_prelu(h, fold, *, tm):
    n_pad, f_pad = h.shape
    g_m = n_pad // tm

    def kernel(h_ref, p_ref, o_ref):
        p = p_ref[...]
        z = h_ref[...].astype(jnp.float32) * p[0:1, :] + p[1:2, :]
        o_ref[...] = jnp.where(z > 0.0, z, z * p[2:3, :])

    return pl.pallas_call(
        kernel,
        out_shape=jax.ShapeDtypeStruct((n_pad, f_pad), jnp.float32),
        grid=(g_m,),
        in_specs=[
            pl.BlockSpec((tm, f_pad), lambda i: (i, 0)),
            pl.BlockSpec((8, f_pad), lambda i: (0, 0)),
        ],
        out_specs=pl.BlockSpec((tm, f_pad), lambda i: (i, 0)),
        compiler_params=pltpu.CompilerParams(
            dimension_semantics=("parallel",),
            vmem_limit_bytes=_VMEM_LIMIT),
    )(h, fold)


# --------------------------------------------------------------------------
# Glue: GCN normalized adjacency (PyG gcn_norm, self-loops) at padded shape
# --------------------------------------------------------------------------
def _build_gcn_adj_padded(edge_index, num_nodes, n_pad, edge_weight=None):
    src, dst = edge_index[0], edge_index[1]
    if edge_weight is None:
        edge_weight = jnp.ones(src.shape[0], jnp.float32)
    loop = jnp.arange(num_nodes, dtype=src.dtype)
    src = jnp.concatenate([src, loop])
    dst = jnp.concatenate([dst, loop])
    ew = jnp.concatenate([edge_weight.astype(jnp.float32),
                          jnp.ones(num_nodes, jnp.float32)])

    deg = jnp.zeros((num_nodes,), jnp.float32).at[dst].add(ew)
    dinv = jnp.where(deg > 0.0, jax.lax.rsqrt(deg), 0.0)
    norm = dinv[src] * ew * dinv[dst]
    # out[i] = sum over edges (j -> i) of norm * x[j]  =>  adj[i, j] += norm.
    # Scatter straight into the padded buffer (single N_pad^2 f32 transient),
    # then cast to bf16 once for the HBM stream.
    adj = jnp.zeros((n_pad, n_pad), jnp.float32).at[dst, src].add(norm)
    return adj.astype(jnp.bfloat16)


def _pad_weight_bf16(w):
    f_in, f_out = w.shape
    return jnp.pad(w, ((0, _round_up(f_in, 128) - f_in),
                       (0, _round_up(f_out, 128) - f_out))).astype(jnp.bfloat16)


def _fold_params(stats, gamma, beta, alpha, f_pad, n_valid):
    """Reduce per-row-tile partials -> global batch stats -> folded scale/shift."""
    stats = stats.reshape(-1, 8, f_pad)
    s = jnp.sum(stats[:, 0, :], axis=0)
    ss = jnp.sum(stats[:, 1, :], axis=0)
    mean = s / n_valid
    var = jnp.maximum(ss / n_valid - mean * mean, 0.0)   # biased (PyTorch training)

    gamma_pad = jnp.pad(gamma, (0, f_pad - gamma.shape[0]))
    beta_pad = jnp.pad(beta, (0, f_pad - beta.shape[0]))
    scale = gamma_pad * jax.lax.rsqrt(var + _BN_EPS)
    shift = beta_pad - scale * mean
    # NOTE: GCNConv bias cancels exactly under training-mode BatchNorm.
    fold = jnp.zeros((8, f_pad), jnp.float32)
    fold = fold.at[0].set(scale).at[1].set(shift)
    fold = fold.at[2].set(jnp.broadcast_to(alpha.astype(jnp.float32), (f_pad,)))
    return fold


# --------------------------------------------------------------------------
# Encoder: deterministic parameter init + forward pass
# --------------------------------------------------------------------------
def init_encoder_params(key, layer_config):
    params = []
    for i in range(1, len(layer_config)):
        f_in, f_out = layer_config[i - 1], layer_config[i]
        key, wk = jax.random.split(key)
        # glorot-uniform W (GCNConv default), zero bias, BN gamma=1/beta=0,
        # PReLU alpha=0.25 (PyTorch defaults)
        limit = (6.0 / (f_in + f_out)) ** 0.5
        w = jax.random.uniform(wk, (f_in, f_out), jnp.float32, -limit, limit)
        b = jnp.zeros((f_out,), jnp.float32)
        gamma = jnp.ones((f_out,), jnp.float32)
        beta = jnp.zeros((f_out,), jnp.float32)
        alpha = jnp.asarray(0.25, jnp.float32)
        params.append((w, b, gamma, beta, alpha))
    return tuple(params)


@jax.jit
def encoder_forward(x, edge_index, params, edge_weight=None):
    n, f0 = x.shape
    n_pad, tm, tk = _plan_tiles(n)
    tm_bn = n_pad if n_pad <= 2048 else 2048   # big row tiles for mem-bound passes

    adj = _build_gcn_adj_padded(edge_index, n, n_pad, edge_weight)

    x_pad = jnp.pad(x, ((0, n_pad - n),
                        (0, _round_up(f0, 128) - f0))).astype(jnp.bfloat16)
    # First layer's hoisted dense transform (tiny vs the O(N^2) aggregation).
    xw = jnp.dot(x_pad, _pad_weight_bf16(params[0][0]),
                 preferred_element_type=jnp.float32).astype(jnp.bfloat16)

    n_layers = len(params)
    out = None
    for i, (w, _b, gamma, beta, alpha) in enumerate(params):
        # _b (GCNConv bias) is a no-op under training-mode BatchNorm; see note.
        f_out_pad = _round_up(w.shape[1], 128)
        h, stats = _aggregate(adj, xw, tm=tm, tk=tk)
        fold = _fold_params(stats, gamma, beta, alpha, f_out_pad, n)
        if i + 1 < n_layers:
            # Fused BN + PReLU + next layer's hoisted X @ W_next (bf16 stream).
            xw = _bn_prelu_matmul(h, fold, _pad_weight_bf16(params[i + 1][0]),
                                  tm=tm_bn)
        else:
            out = _bn_prelu(h, fold, tm=tm_bn)

    f_last = params[-1][0].shape[1]
    return out[:n, :f_last]


if __name__ == "__main__":
    key = jax.random.PRNGKey(0)

    # Small synthetic graph: N nodes, ring graph (both directions)
    num_nodes = 16
    layer_config = [8, 32, 16]

    k_x, k_p = jax.random.split(key)
    x = jax.random.normal(k_x, (num_nodes, layer_config[0]), jnp.float32)

    src = jnp.arange(num_nodes, dtype=jnp.int32)
    dst = (src + 1) % num_nodes
    edge_index = jnp.stack(
        [jnp.concatenate([src, dst]), jnp.concatenate([dst, src])], axis=0
    )  # shape (2, 2N)

    params = init_encoder_params(k_p, layer_config)

    out = encoder_forward(x, edge_index, params)
    jax.block_until_ready(out)

    assert out.shape == (num_nodes, layer_config[-1])
    assert bool(jnp.all(jnp.isfinite(out)))
    print("KERNEL_OK")
</pallas_src>

<mosaic_0001>
module attributes {stable_mosaic.version = 11 : i64} {
  func.func @kernel(%arg0: i32, %arg1: i32, %arg2: memref<128x128xbf16, #tpu.memory_space<vmem>>, %arg3: memref<128x128xbf16, #tpu.memory_space<vmem>>, %arg4: memref<128x128xbf16, #tpu.memory_space<vmem>>, %arg5: memref<8x128xf32, #tpu.memory_space<vmem>>, %arg6: memref<128x128xf32, #tpu.memory_space<vmem>>) attributes {dimension_semantics = [#tpu.dimension_semantics<parallel>, #tpu.dimension_semantics<arbitrary>], iteration_bounds = array<i64: 1, 1>, scalar_prefetch = 0 : i64, scratch_operands = 1 : i64, tpu.core_type = #tpu.core_type<tc>, window_params = [{transform_indices = @transform_0, window_bounds = array<i64: 128, 128>}, {pipeline_mode = #tpu.pipeline_mode<synchronous>, transform_indices = @transform_1, window_bounds = array<i64: 128, 128>}, {transform_indices = @transform_2, window_bounds = array<i64: 128, 128>}, {transform_indices = @transform_3, window_bounds = array<i64: 8, 128>}]} {
    %c0_i32 = arith.constant 0 : i32
    %0 = arith.cmpi eq, %arg1, %c0_i32 : i32
    %1 = arith.extui %0 : i1 to i32
    %c0_i32_0 = arith.constant 0 : i32
    %2 = arith.cmpi ne, %1, %c0_i32_0 : i32
    scf.if %2 {
      %cst_10 = arith.constant 0.000000e+00 : f32
      %12 = vector.broadcast %cst_10 : f32 to vector<128x128xf32>
      %c0_11 = arith.constant 0 : index
      %c0_12 = arith.constant 0 : index
      %13 = vector.load %arg6[%c0_11, %c0_12] : memref<128x128xf32, #tpu.memory_space<vmem>>, vector<128x128xf32>
      tpu.vector_store %arg6[%c0_11, %c0_12], %12 {strides = array<i32>} : memref<128x128xf32, #tpu.memory_space<vmem>>, vector<128x128xf32>,
    } else {
    }
    %c0 = arith.constant 0 : index
    %c0_1 = arith.constant 0 : index
    %3 = vector.load %arg3[%c0, %c0_1] : memref<128x128xbf16, #tpu.memory_space<vmem>>, vector<128x128xbf16>
    %c0_2 = arith.constant 0 : index
    %c0_3 = arith.constant 0 : index
    %4 = vector.load %arg6[%c0_2, %c0_3] : memref<128x128xf32, #tpu.memory_space<vmem>>, vector<128x128xf32>
    %c0_4 = arith.constant 0 : index
    %c0_5 = arith.constant 0 : index
    %5 = vector.load %arg2[%c0_4, %c0_5] : memref<128x128xbf16, #tpu.memory_space<vmem>>, vector<128x128xbf16>
    %cst = arith.constant dense<0.000000e+00> : vector<128x128xf32>
    %6 = tpu.matmul %5, %3, %cst {dimension_numbers = #tpu.dot_dimension_numbers<[1], [0], [0], [1], [0, 0, 1, 1], [], []>} : vector<128x128xbf16>, vector<128x128xbf16>, vector<128x128xf32> -> vector<128x128xf32>
    %7 = arith.addf %4, %6 : vector<128x128xf32>
    %c0_6 = arith.constant 0 : index
    %c0_7 = arith.constant 0 : index
    %8 = vector.load %arg6[%c0_6, %c0_7] : memref<128x128xf32, #tpu.memory_space<vmem>>, vector<128x128xf32>
    tpu.vector_store %arg6[%c0_6, %c0_7], %7 {strides = array<i32>} : memref<128x128xf32, #tpu.memory_space<vmem>>, vector<128x128xf32>,
    %c0_i32_8 = arith.constant 0 : i32
    %9 = arith.cmpi eq, %arg1, %c0_i32_8 : i32
    %10 = arith.extui %9 : i1 to i32
    %c0_i32_9 = arith.constant 0 : i32
    %11 = arith.cmpi ne, %10, %c0_i32_9 : i32
    scf.if %11 {
      %c0_10 = arith.constant 0 : index
      %c0_11 = arith.constant 0 : index
      %12 = vector.load %arg6[%c0_10, %c0_11] : memref<128x128xf32, #tpu.memory_space<vmem>>, vector<128x128xf32>
      %13 = arith.truncf %12 : vector<128x128xf32> to vector<128x128xbf16>
      %c0_12 = arith.constant 0 : index
      %c0_13 = arith.constant 0 : index
      %14 = vector.load %arg4[%c0_12, %c0_13] : memref<128x128xbf16, #tpu.memory_space<vmem>>, vector<128x128xbf16>
      tpu.vector_store %arg4[%c0_12, %c0_13], %13 {strides = array<i32>} : memref<128x128xbf16, #tpu.memory_space<vmem>>, vector<128x128xbf16>,
      %cst_14 = arith.constant dense<0.000000e+00> : vector<128xf32>
      %15 = vector.multi_reduction <add>, %12, %cst_14 [0] : vector<128x128xf32> to vector<128xf32>
      %16 = vector.shape_cast %15 : vector<128xf32> to vector<1x128xf32>
      %c0_15 = arith.constant 0 : index
      %c0_16 = arith.constant 0 : index
      %17 = vector.load %arg5[%c0_15, %c0_16] : memref<8x128xf32, #tpu.memory_space<vmem>>, vector<1x128xf32>
      tpu.vector_store %arg5[%c0_15, %c0_16], %16 {strides = array<i32>} : memref<8x128xf32, #tpu.memory_space<vmem>>, vector<1x128xf32>,
      %18 = arith.mulf %12, %12 : vector<128x128xf32>
      %cst_17 = arith.constant dense<0.000000e+00> : vector<128xf32>
      %19 = vector.multi_reduction <add>, %18, %cst_17 [0] : vector<128x128xf32> to vector<128xf32>
      %20 = vector.shape_cast %19 : vector<128xf32> to vector<1x128xf32>
      %c1 = arith.constant 1 : index
      %c0_18 = arith.constant 0 : index
      %21 = vector.load %arg5[%c1, %c0_18] : memref<8x128xf32, #tpu.memory_space<vmem>>, vector<1x128xf32>
      tpu.vector_store %arg5[%c1, %c0_18], %20 {strides = array<i32>} : memref<8x128xf32, #tpu.memory_space<vmem>>, vector<1x128xf32>,
    } else {
    }
    return
  }
  func.func @transform_0(%arg0: i32, %arg1: i32) -> (i32, i32) {
    %c0_i32 = arith.constant 0 : i32
    return %arg0, %arg1 : i32, i32
  }
  func.func @transform_1(%arg0: i32, %arg1: i32) -> (i32, i32) {
    %c0_i32 = arith.constant 0 : i32
    %c0_i32_0 = arith.constant 0 : i32
    %c0_i32_1 = arith.constant 0 : i32
    return %c0_i32, %c0_i32_0 : i32, i32
  }
  func.func @transform_2(%arg0: i32, %arg1: i32) -> (i32, i32) {
    %c0_i32 = arith.constant 0 : i32
    %c0_i32_0 = arith.constant 0 : i32
    return %arg0, %c0_i32 : i32, i32
  }
  func.func @transform_3(%arg0: i32, %arg1: i32) -> (i32, i32) {
    %c0_i32 = arith.constant 0 : i32
    %c0_i32_0 = arith.constant 0 : i32
    return %arg0, %c0_i32 : i32, i32
  }
}

module attributes {stable_mosaic.version = 11 : i64} {
  func.func @kernel(%arg0: i32, %arg1: memref<128x128xbf16, #tpu.memory_space<vmem>>, %arg2: memref<8x128xf32, #tpu.memory_space<vmem>>, %arg3: memref<128x128xbf16, #tpu.memory_space<vmem>>, %arg4: memref<128x128xbf16, #tpu.memory_space<vmem>>) attributes {dimension_semantics = [#tpu.dimension_semantics<parallel>], iteration_bounds = array<i64: 1>, scalar_prefetch = 0 : i64, scratch_operands = 0 : i64, tpu.core_type = #tpu.core_type<tc>, window_params = [{transform_indices = @transform_0, window_bounds = array<i64: 128, 128>}, {pipeline_mode = #tpu.pipeline_mode<synchronous>, transform_indices = @transform_1, window_bounds = array<i64: 8, 128>}, {pipeline_mode = #tpu.pipeline_mode<synchronous>, transform_indices = @transform_2, window_bounds = array<i64: 128, 128>}, {transform_indices = @transform_3, window_bounds = array<i64: 128, 128>}]} {
    %c0 = arith.constant 0 : index
    %c0_0 = arith.constant 0 : index
    %0 = vector.load %arg2[%c0, %c0_0] : memref<8x128xf32, #tpu.memory_space<vmem>>, vector<8x128xf32>
    %c0_1 = arith.constant 0 : index
    %c0_2 = arith.constant 0 : index
    %1 = vector.load %arg1[%c0_1, %c0_2] : memref<128x128xbf16, #tpu.memory_space<vmem>>, vector<128x128xbf16>
    %2 = arith.extf %1 : vector<128x128xbf16> to vector<128x128xf32>
    %3 = vector.extract_strided_slice %0 {offsets = [0, 0], sizes = [1, 128], strides = [1, 1]} : vector<8x128xf32> to vector<1x128xf32>
    %4 = vector.broadcast %3 : vector<1x128xf32> to vector<128x128xf32>
    %5 = arith.mulf %2, %4 : vector<128x128xf32>
    %6 = vector.extract_strided_slice %0 {offsets = [1, 0], sizes = [1, 128], strides = [1, 1]} : vector<8x128xf32> to vector<1x128xf32>
    %7 = vector.broadcast %6 : vector<1x128xf32> to vector<128x128xf32>
    %8 = arith.addf %5, %7 : vector<128x128xf32>
    %cst = arith.constant 0.000000e+00 : f32
    %9 = vector.broadcast %cst : f32 to vector<128x128xf32>
    %10 = arith.cmpf ogt, %8, %9 : vector<128x128xf32>
    %11 = vector.extract_strided_slice %0 {offsets = [2, 0], sizes = [1, 128], strides = [1, 1]} : vector<8x128xf32> to vector<1x128xf32>
    %12 = vector.broadcast %11 : vector<1x128xf32> to vector<128x128xf32>
    %13 = arith.mulf %8, %12 : vector<128x128xf32>
    %14 = arith.select %10, %8, %13 : vector<128x128xi1>, vector<128x128xf32>
    %15 = arith.truncf %14 : vector<128x128xf32> to vector<128x128xbf16>
    %c0_3 = arith.constant 0 : index
    %c0_4 = arith.constant 0 : index
    %16 = vector.load %arg3[%c0_3, %c0_4] : memref<128x128xbf16, #tpu.memory_space<vmem>>, vector<128x128xbf16>
    %cst_5 = arith.constant dense<0.000000e+00> : vector<128x128xf32>
    %17 = tpu.matmul %15, %16, %cst_5 {dimension_numbers = #tpu.dot_dimension_numbers<[1], [0], [0], [1], [0, 0, 1, 1], [], []>} : vector<128x128xbf16>, vector<128x128xbf16>, vector<128x128xf32> -> vector<128x128xf32>
    %18 = arith.truncf %17 : vector<128x128xf32> to vector<128x128xbf16>
    %c0_6 = arith.constant 0 : index
    %c0_7 = arith.constant 0 : index
    %19 = vector.load %arg4[%c0_6, %c0_7] : memref<128x128xbf16, #tpu.memory_space<vmem>>, vector<128x128xbf16>
    tpu.vector_store %arg4[%c0_6, %c0_7], %18 {strides = array<i32>} : memref<128x128xbf16, #tpu.memory_space<vmem>>, vector<128x128xbf16>,
    return
  }
  func.func @transform_0(%arg0: i32) -> (i32, i32) {
    %c0_i32 = arith.constant 0 : i32
    %c0_i32_0 = arith.constant 0 : i32
    return %arg0, %c0_i32 : i32, i32
  }
  func.func @transform_1(%arg0: i32) -> (i32, i32) {
    %c0_i32 = arith.constant 0 : i32
    %c0_i32_0 = arith.constant 0 : i32
    %c0_i32_1 = arith.constant 0 : i32
    return %c0_i32, %c0_i32_0 : i32, i32
  }
  func.func @transform_2(%arg0: i32) -> (i32, i32) {
    %c0_i32 = arith.constant 0 : i32
    %c0_i32_0 = arith.constant 0 : i32
    %c0_i32_1 = arith.constant 0 : i32
    return %c0_i32, %c0_i32_0 : i32, i32
  }
  func.func @transform_3(%arg0: i32) -> (i32, i32) {
    %c0_i32 = arith.constant 0 : i32
    %c0_i32_0 = arith.constant 0 : i32
    return %arg0, %c0_i32 : i32, i32
  }
}

module attributes {stable_mosaic.version = 11 : i64} {
  func.func @kernel(%arg0: i32, %arg1: memref<128x128xbf16, #tpu.memory_space<vmem>>, %arg2: memref<8x128xf32, #tpu.memory_space<vmem>>, %arg3: memref<128x128xf32, #tpu.memory_space<vmem>>) attributes {dimension_semantics = [#tpu.dimension_semantics<parallel>], iteration_bounds = array<i64: 1>, scalar_prefetch = 0 : i64, scratch_operands = 0 : i64, tpu.core_type = #tpu.core_type<tc>, window_params = [{transform_indices = @transform_0, window_bounds = array<i64: 128, 128>}, {pipeline_mode = #tpu.pipeline_mode<synchronous>, transform_indices = @transform_1, window_bounds = array<i64: 8, 128>}, {transform_indices = @transform_2, window_bounds = array<i64: 128, 128>}]} {
    %c0 = arith.constant 0 : index
    %c0_0 = arith.constant 0 : index
    %0 = vector.load %arg2[%c0, %c0_0] : memref<8x128xf32, #tpu.memory_space<vmem>>, vector<8x128xf32>
    %c0_1 = arith.constant 0 : index
    %c0_2 = arith.constant 0 : index
    %1 = vector.load %arg1[%c0_1, %c0_2] : memref<128x128xbf16, #tpu.memory_space<vmem>>, vector<128x128xbf16>
    %2 = arith.extf %1 : vector<128x128xbf16> to vector<128x128xf32>
    %3 = vector.extract_strided_slice %0 {offsets = [0, 0], sizes = [1, 128], strides = [1, 1]} : vector<8x128xf32> to vector<1x128xf32>
    %4 = vector.broadcast %3 : vector<1x128xf32> to vector<128x128xf32>
    %5 = arith.mulf %2, %4 : vector<128x128xf32>
    %6 = vector.extract_strided_slice %0 {offsets = [1, 0], sizes = [1, 128], strides = [1, 1]} : vector<8x128xf32> to vector<1x128xf32>
    %7 = vector.broadcast %6 : vector<1x128xf32> to vector<128x128xf32>
    %8 = arith.addf %5, %7 : vector<128x128xf32>
    %cst = arith.constant 0.000000e+00 : f32
    %9 = vector.broadcast %cst : f32 to vector<128x128xf32>
    %10 = arith.cmpf ogt, %8, %9 : vector<128x128xf32>
    %11 = vector.extract_strided_slice %0 {offsets = [2, 0], sizes = [1, 128], strides = [1, 1]} : vector<8x128xf32> to vector<1x128xf32>
    %12 = vector.broadcast %11 : vector<1x128xf32> to vector<128x128xf32>
    %13 = arith.mulf %8, %12 : vector<128x128xf32>
    %14 = arith.select %10, %8, %13 : vector<128x128xi1>, vector<128x128xf32>
    %c0_3 = arith.constant 0 : index
    %c0_4 = arith.constant 0 : index
    %15 = vector.load %arg3[%c0_3, %c0_4] : memref<128x128xf32, #tpu.memory_space<vmem>>, vector<128x128xf32>
    tpu.vector_store %arg3[%c0_3, %c0_4], %14 {strides = array<i32>} : memref<128x128xf32, #tpu.memory_space<vmem>>, vector<128x128xf32>,
    return
  }
  func.func @transform_0(%arg0: i32) -> (i32, i32) {
    %c0_i32 = arith.constant 0 : i32
    %c0_i32_0 = arith.constant 0 : i32
    return %arg0, %c0_i32 : i32, i32
  }
  func.func @transform_1(%arg0: i32) -> (i32, i32) {
    %c0_i32 = arith.constant 0 : i32
    %c0_i32_0 = arith.constant 0 : i32
    %c0_i32_1 = arith.constant 0 : i32
    return %c0_i32, %c0_i32_0 : i32, i32
  }
  func.func @transform_2(%arg0: i32) -> (i32, i32) {
    %c0_i32 = arith.constant 0 : i32
    %c0_i32_0 = arith.constant 0 : i32
    return %arg0, %c0_i32 : i32, i32
  }
}

</mosaic_0001>

<bundles_post_ra>
// kernel: mul.7
= control target key start
LH: loop header
LB: loop body
LE: loop exit
PB: predicated region body
PF: predicated region fallthrough
CT: control target
= control target key end

     0   :  { %s34_s0 = inlined_call_operand.vmem [shape: f32[48], index: 0, kind: input, shape index: {}]   ;;  %s35_s1 = inlined_call_operand.vmem [shape: f32[48], index: 1, kind: input, shape index: {}]   ;;  %s36_s2 = inlined_call_operand.vmem [shape: f32[48], index: 2, kind: output, shape index: {}]  }
   0x1   :  { %v3_v0 = vld [vmem:[%s34_s0] sm:$0x1] }
   0x2   :  { %v4_v1 = vld [vmem:[%s35_s1] sm:$0x1] }
   0x3   :  { %v7_v2 = vmul.f32 %v4_v1, %v3_v0 }
   0x5   :  { %9 = vst [vmem:[%s36_s2] sm:$0x1] %v7_v2 }

// kernel: encoder_forward.4
= control target key start
LH: loop header
LB: loop body
LE: loop exit
PB: predicated region body
PF: predicated region fallthrough
CT: control target
= control target key end

     0   :  { %s632_s1 = inlined_call_operand.vmem [shape: bf16[128,128], index: 1, kind: input, shape index: {}]   ;;  %s633_s0 = inlined_call_operand.vmem [shape: bf16[128,128], index: 0, kind: input, shape index: {}]   ;;  %s634_s2 = inlined_call_operand.vmem [shape: bf16[128,128], index: 2, kind: output, shape index: {0}]   ;;  %s635_s3 = inlined_call_operand.vmem [shape: f32[8,128], index: 3, kind: output, shape index: {1}]  }
   0x1   :  { %v448_v0 = vld [vmem:[%s632_s1 + $0x38] sm:$0xff]  ;;  %v447_v1 = vld [vmem:[%s632_s1 + $0x30] sm:$0xff]  ;;  %v446_v2 = vld [vmem:[%s632_s1 + $0x28] sm:$0xff] }
   0x2   :  { %177 = vmatpush.bf16.msra.mxu0 %v448_v0  ;;  %504 = vmatpush.bf16.msra.mxu1 %v448_v0  ;;  %v445_v3 = vld [vmem:[%s632_s1 + $0x20] sm:$0xff]  ;;  %v444_v4 = vld [vmem:[%s632_s1 + $0x18] sm:$0xff]  ;;  %v443_v5 = vld [vmem:[%s632_s1 + $0x10] sm:$0xff] }
   0x3   :  { %505 = vmatpush.bf16.msra.mxu2 %v448_v0  ;;  %506 = vmatpush.bf16.msra.mxu3 %v448_v0  ;;  %v442_v6 = vld [vmem:[%s632_s1 + $0x8] sm:$0xff]  ;;  %v441_v7 = vld [vmem:[%s632_s1] sm:$0xff]  ;;  %v451_v9 = vld [vmem:[%s633_s0 + $0x10] sm:$0xff] }
   0x4   :  { %v449_v8 = vld [vmem:[%s633_s0] sm:$0xff]  ;;  %v455_v11 = vld [vmem:[%s633_s0 + $0x30] sm:$0xff]  ;;  %v450_v12 = vld [vmem:[%s633_s0 + $0x8] sm:$0xff] }
   0x5   :  { %v453_v10 = vld [vmem:[%s633_s0 + $0x20] sm:$0xff]  ;;  %v452_v13 = vld [vmem:[%s633_s0 + $0x18] sm:$0xff]  ;;  %v454_v14 = vld [vmem:[%s633_s0 + $0x28] sm:$0xff] }
   0x6   :  { %178 = vmatpush.bf16.msra.mxu0 %v447_v1  ;;  %507 = vmatpush.bf16.msra.mxu1 %v447_v1  ;;  %v456_v15 = vld [vmem:[%s633_s0 + $0x38] sm:$0xff] }
   0x7   :  { %508 = vmatpush.bf16.msra.mxu2 %v447_v1  ;;  %509 = vmatpush.bf16.msra.mxu3 %v447_v1 }
   0xa   :  { %179 = vmatpush.bf16.msra.mxu0 %v446_v2  ;;  %510 = vmatpush.bf16.msra.mxu1 %v446_v2 }
   0xb   :  { %511 = vmatpush.bf16.msra.mxu2 %v446_v2  ;;  %512 = vmatpush.bf16.msra.mxu3 %v446_v2 }
   0xe   :  { %180 = vmatpush.bf16.msra.mxu0 %v445_v3  ;;  %513 = vmatpush.bf16.msra.mxu1 %v445_v3 }
   0xf   :  { %514 = vmatpush.bf16.msra.mxu2 %v445_v3  ;;  %515 = vmatpush.bf16.msra.mxu3 %v445_v3 }
  0x12   :  { %181 = vmatpush.bf16.msra.mxu0 %v444_v4  ;;  %516 = vmatpush.bf16.msra.mxu1 %v444_v4 }
  0x13   :  { %517 = vmatpush.bf16.msra.mxu2 %v444_v4  ;;  %518 = vmatpush.bf16.msra.mxu3 %v444_v4 }
  0x16   :  { %182 = vmatpush.bf16.msra.mxu0 %v443_v5  ;;  %519 = vmatpush.bf16.msra.mxu1 %v443_v5 }
  0x17   :  { %520 = vmatpush.bf16.msra.mxu2 %v443_v5  ;;  %521 = vmatpush.bf16.msra.mxu3 %v443_v5 }
  0x1a   :  { %183 = vmatpush.bf16.msra.mxu0 %v442_v6  ;;  %522 = vmatpush.bf16.msra.mxu1 %v442_v6 }
  0x1b   :  { %523 = vmatpush.bf16.msra.mxu2 %v442_v6  ;;  %524 = vmatpush.bf16.msra.mxu3 %v442_v6 }
  0x1e   :  { %184 = vmatpush.bf16.msra.mxu0 %v441_v7  ;;  %525 = vmatpush.bf16.msra.mxu1 %v441_v7 }
  0x1f   :  { %526 = vmatpush.bf16.msra.mxu2 %v441_v7  ;;  %527 = vmatpush.bf16.msra.mxu3 %v441_v7 }
  0x21   :  { %185 = vmatmul.bf16.vlgmr.msra.gmra.mxu0 %v449_v8  ;;  %195 = vmatmul.bf16.vlgmr.msra.gmra.mxu1 %v451_v9 }
  0x22   :  { %205 = vmatmul.bf16.vlgmr.msra.gmra.mxu2 %v453_v10  ;;  %215 = vmatmul.bf16.vlgmr.msra.gmra.mxu3 %v455_v11 }
  0x31   :  { %190 = vmatmul.bf16.gmra.mxu0 %v450_v12  ;;  %200 = vmatmul.bf16.gmra.mxu1 %v452_v13 }
  0x32   :  { %210 = vmatmul.bf16.gmra.mxu2 %v454_v14  ;;  %220 = vmatmul.bf16.gmra.mxu3 %v456_v15 }
  0x9e   :  { %v186_v16 = vpop.f32.mrf.mxu0  ;;  %v196_v17 = vpop.f32.mrf.mxu1 }
  0x9f   :  { %v331_v31 = vmul.f32 %v186_v16, %v186_v16  ;;  %v335_v45 = vmul.f32 %v196_v17, %v196_v17 }
  0xa5   :  { %v206_v18 = vpop.f32.mrf.mxu2  ;;  %v596_v19 = vpop.f32.mrf.mxu3 }
  0xa6   :  { %v188_v20 = vpop.f32.mrf.mxu0  ;;  %v198_v21 = vpop.f32.mrf.mxu1  ;;  %v339_v61 = vmul.f32 %v206_v18, %v206_v18  ;;  %v343_v9 = vmul.f32 %v596_v19, %v596_v19 }
  0xa7   :  { %v460_v22 = vpack.c.bf16 %v188_v20, %v186_v16  ;;  %v470_v23 = vpack.c.bf16 %v198_v21, %v196_v17  ;;  %v332_v30 = vmul.f32 %v188_v20, %v188_v20  ;;  %v309_v33 = vadd.f32 %v188_v20, %v186_v16 }
  0xa8   :  { %v336_v48 = vmul.f32 %v198_v21, %v198_v21 }
  0xa9   :  { %461 = vst [vmem:[%s634_s2] sm:$0xff] %v460_v22   ;;  %v347_v34 = vadd.f32 %v332_v30, %v331_v31 }
  0xaa   :  { %498 = vst [vmem:[%s634_s2 + $0x10] sm:$0xff] %v470_v23  }
  0xad   :  { %v208_v24 = vpop.f32.mrf.mxu2  ;;  %v218_v25 = vpop.f32.mrf.mxu3 }
  0xae   :  { %v191_v26 = vpop.f32.mrf.mxu0  ;;  %v201_v27 = vpop.f32.mrf.mxu1  ;;  %v480_v28 = vpack.c.bf16 %v208_v24, %v206_v18  ;;  %v490_v29 = vpack.c.bf16 %v218_v25, %v596_v19  ;;  %v340_v0 = vmul.f32 %v208_v24, %v208_v24  ;;  %v344_v12 = vmul.f32 %v218_v25, %v218_v25 }
  0xaf   :  { %v333_v32 = vmul.f32 %v191_v26, %v191_v26  ;;  %v310_v35 = vadd.f32 %v309_v33, %v191_v26  ;;  %v337_v51 = vmul.f32 %v201_v27, %v201_v27 }
  0xb0   :  { %500 = vst [vmem:[%s634_s2 + $0x20] sm:$0xff] %v480_v28  }
  0xb1   :  { %502 = vst [vmem:[%s634_s2 + $0x30] sm:$0xff] %v490_v29   ;;  %v348_v38 = vadd.f32 %v347_v34, %v333_v32 }
  0xb5   :  { %v211_v36 = vpop.f32.mrf.mxu2  ;;  %v221_v37 = vpop.f32.mrf.mxu3 }
  0xb6   :  { %v193_v39 = vpop.f32.mrf.mxu0  ;;  %v203_v40 = vpop.f32.mrf.mxu1  ;;  %v341_v4 = vmul.f32 %v211_v36, %v211_v36  ;;  %v345_v16 = vmul.f32 %v221_v37, %v221_v37 }
  0xb7   :  { %v465_v41 = vpack.c.bf16 %v193_v39, %v191_v26  ;;  %v311_v42 = vadd.f32 %v310_v35, %v193_v39  ;;  %v334_v43 = vmul.f32 %v193_v39, %v193_v39  ;;  %v475_v44 = vpack.c.bf16 %v203_v40, %v201_v27 }
  0xb8   :  { %v338_v59 = vmul.f32 %v203_v40, %v203_v40 }
  0xb9   :  { %497 = vst [vmem:[%s634_s2 + $0x8] sm:$0xff] %v465_v41   ;;  %v312_v46 = vadd.f32 %v311_v42, %v196_v17  ;;  %v349_v47 = vadd.f32 %v348_v38, %v334_v43 }
  0xba   :  { %499 = vst [vmem:[%s634_s2 + $0x18] sm:$0xff] %v475_v44  }
  0xbb   :  { %v350_v49 = vadd.f32 %v349_v47, %v335_v45  ;;  %v313_v50 = vadd.f32 %v312_v46, %v198_v21 }
  0xbd   :  { %v314_v52 = vadd.f32 %v313_v50, %v201_v27  ;;  %v351_v53 = vadd.f32 %v350_v49, %v336_v48  ;;  %v213_v54 = vpop.f32.mrf.mxu2  ;;  %v223_v55 = vpop.f32.mrf.mxu3 }
  0xbe   :  { %v485_v56 = vpack.c.bf16 %v213_v54, %v211_v36  ;;  %v495_v57 = vpack.c.bf16 %v223_v55, %v221_v37  ;;  %v342_v8 = vmul.f32 %v213_v54, %v213_v54  ;;  %v346_v21 = vmul.f32 %v223_v55, %v223_v55 }
  0xbf   :  { %v315_v58 = vadd.f32 %v314_v52, %v203_v40  ;;  %v352_v60 = vadd.f32 %v351_v53, %v337_v51 }
  0xc0   :  { %501 = vst [vmem:[%s634_s2 + $0x28] sm:$0xff] %v485_v56  }
  0xc1   :  { %v316_v62 = vadd.f32 %v315_v58, %v206_v18  ;;  %v353_v63 = vadd.f32 %v352_v60, %v338_v59  ;;  %503 = vst [vmem:[%s634_s2 + $0x38] sm:$0xff] %v495_v57  }
  0xc3   :  { %v354_v1 = vadd.f32 %v353_v63, %v339_v61  ;;  %v317_v2 = vadd.f32 %v316_v62, %v208_v24 }
  0xc5   :  { %v318_v3 = vadd.f32 %v317_v2, %v211_v36  ;;  %v355_v5 = vadd.f32 %v354_v1, %v340_v0 }
  0xc7   :  { %v356_v6 = vadd.f32 %v355_v5, %v341_v4  ;;  %v319_v7 = vadd.f32 %v318_v3, %v213_v54 }
  0xc9   :  { %v320_v10 = vadd.f32 %v319_v7, %v596_v19  ;;  %v357_v11 = vadd.f32 %v356_v6, %v342_v8 }
  0xcb   :  { %v358_v13 = vadd.f32 %v357_v11, %v343_v9  ;;  %v321_v14 = vadd.f32 %v320_v10, %v218_v25 }
  0xcd   :  { %v322_v15 = vadd.f32 %v321_v14, %v221_v37  ;;  %v359_v17 = vadd.f32 %v358_v13, %v344_v12 }
  0xcf   :  { %v360_v18 = vadd.f32 %v359_v17, %v345_v16  ;;  %v323_v20 = vadd.f32 %v322_v15, %v223_v55 }
  0xd1   :  { %v324_v22 = vrot.slane %v323_v20, 4  ;;  %v361_v23 = vadd.f32 %v360_v18, %v346_v21 }
  0xd3   :  { %v325_v24 = vadd.f32 %v324_v22, %v323_v20  ;;  %v362_v26 = vrot.slane %v361_v23, 4 }
  0xd5   :  { %v326_v27 = vrot.slane %v325_v24, 2  ;;  %v363_v28 = vadd.f32 %v362_v26, %v361_v23 }
  0xd7   :  { %v327_v29 = vadd.f32 %v326_v27, %v325_v24  ;;  %v364_v30 = vrot.slane %v363_v28, 2 }
  0xd9   :  { %v328_v31 = vrot.slane %v327_v29, 1  ;;  %v365_v19 = vadd.f32 %v364_v30, %v363_v28 }
  0xdb   :  { %v329_v32 = vadd.f32 %v328_v31, %v327_v29  ;;  %v366_v33 = vrot.slane %v365_v19, 1 }
  0xdd   :  { %330 = vst [vmem:[%s635_s3] sm:$0x1] %v329_v32  ;;  %v367_v25 = vadd.f32 %v366_v33, %v365_v19 }
  0xdf   :  { %368 = vst [vmem:[%s635_s3 + $0x1] sm:$0x1] %v367_v25 }

// kernel: encoder_forward.5
= control target key start
LH: loop header
LB: loop body
LE: loop exit
PB: predicated region body
PF: predicated region fallthrough
CT: control target
= control target key end

     0   :  { %s596_s2 = inlined_call_operand.vmem [shape: bf16[128,128], index: 2, kind: input, shape index: {}]   ;;  %s597_s0 = inlined_call_operand.vmem [shape: bf16[128,128], index: 0, kind: input, shape index: {}]   ;;  %s598_s1 = inlined_call_operand.vmem [shape: f32[8,128], index: 1, kind: input, shape index: {}]   ;;  %s599_s3 = inlined_call_operand.vmem [shape: bf16[128,128], index: 3, kind: output, shape index: {}]  }
   0x1   :  { %v326_v0 = vld [vmem:[%s596_s2 + $0x38] sm:$0xff]  ;;  %v325_v1 = vld [vmem:[%s596_s2 + $0x30] sm:$0xff]  ;;  %v14_v2 = vld [vmem:[%s598_s1] sm:$0xff] }
   0x2   :  { %202 = vmatpush.bf16.msra.mxu0 %v326_v0  ;;  %413 = vmatpush.bf16.msra.mxu1 %v326_v0  ;;  %v328_v3 = vld [vmem:[%s597_s0] sm:$0xff]   ;;  %v324_v4 = vld [vmem:[%s596_s2 + $0x28] sm:$0xff]  ;;  %v400_v5 = vld [vmem:[%s597_s0 + $0x10] sm:$0xff]   ;;  %v481_v10 = vperm.slane %v14_v2, 0  ;;  %v488_v20 = vperm.slane %v14_v2, 1  ;;  %v501_v30 = vperm.slane %v14_v2, 2 }
   0x3   :  { %414 = vmatpush.bf16.msra.mxu2 %v326_v0  ;;  %415 = vmatpush.bf16.msra.mxu3 %v326_v0  ;;  %v402_v6 = vld [vmem:[%s597_s0 + $0x20] sm:$0xff]   ;;  %v404_v7 = vld [vmem:[%s597_s0 + $0x30] sm:$0xff]   ;;  %v329_v8 = vunpack.c.l.bf16 %v328_v3  ;;  %v330_v9 = vunpack.c.h.bf16 %v328_v3  ;;  %v337_v11 = vunpack.c.l.bf16 %v400_v5  ;;  %v338_v12 = vunpack.c.h.bf16 %v400_v5  ;;  %v322_v24 = vld [vmem:[%s596_s2 + $0x18] sm:$0xff] }
   0x4   :  { %v345_v13 = vunpack.c.l.bf16 %v402_v6  ;;  %v323_v14 = vld [vmem:[%s596_s2 + $0x20] sm:$0xff]  ;;  %v346_v15 = vunpack.c.h.bf16 %v402_v6  ;;  %v353_v16 = vunpack.c.l.bf16 %v404_v7  ;;  %v354_v17 = vunpack.c.h.bf16 %v404_v7  ;;  %v321_v34 = vld [vmem:[%s596_s2 + $0x10] sm:$0xff]  ;;  %v399_v40 = vld [vmem:[%s597_s0 + $0x8] sm:$0xff]  }
   0x5   :  { %v48_v18 = vmul.f32 %v329_v8, %v481_v10  ;;  %v49_v19 = vmul.f32 %v330_v9, %v481_v10  ;;  %v52_v21 = vmul.f32 %v337_v11, %v481_v10  ;;  %v53_v22 = vmul.f32 %v338_v12, %v481_v10  ;;  %v320_v44 = vld [vmem:[%s596_s2 + $0x8] sm:$0xff]  ;;  %v401_v47 = vld [vmem:[%s597_s0 + $0x18] sm:$0xff]   ;;  %v319_v59 = vld [vmem:[%s596_s2] sm:$0xff] }
   0x6   :  { %203 = vmatpush.bf16.msra.mxu0 %v325_v1  ;;  %416 = vmatpush.bf16.msra.mxu1 %v325_v1  ;;  %v56_v23 = vmul.f32 %v345_v13, %v481_v10  ;;  %v57_v25 = vmul.f32 %v346_v15, %v481_v10  ;;  %v60_v26 = vmul.f32 %v353_v16, %v481_v10  ;;  %v333_v49 = vunpack.c.l.bf16 %v399_v40  ;;  %v403_v50 = vld [vmem:[%s597_s0 + $0x28] sm:$0xff]   ;;  %v405_v54 = vld [vmem:[%s597_s0 + $0x38] sm:$0xff]  }
   0x7   :  { %417 = vmatpush.bf16.msra.mxu2 %v325_v1  ;;  %418 = vmatpush.bf16.msra.mxu3 %v325_v1  ;;  %v61_v27 = vmul.f32 %v354_v17, %v481_v10  ;;  %v65_v28 = vadd.f32 %v488_v20, %v48_v18  ;;  %v66_v29 = vadd.f32 %v488_v20, %v49_v19  ;;  %v334_v53 = vunpack.c.h.bf16 %v399_v40 }
   0x8   :  { %v69_v31 = vadd.f32 %v488_v20, %v52_v21  ;;  %v70_v32 = vadd.f32 %v488_v20, %v53_v22  ;;  %v73_v33 = vadd.f32 %v488_v20, %v56_v23  ;;  %v74_v35 = vadd.f32 %v488_v20, %v57_v25 }
   0x9   :  { %v77_v36 = vadd.f32 %v488_v20, %v60_v26  ;;  %v78_v37 = vadd.f32 %v488_v20, %v61_v27  ;;  %vm81_vm0 = vcmp.gt.f32.partialorder %v65_v28, 0.0  ;;  %vm82_vm1 = vcmp.gt.f32.partialorder %v66_v29, 0.0 }
   0xa   :  { %204 = vmatpush.bf16.msra.mxu0 %v324_v4  ;;  %419 = vmatpush.bf16.msra.mxu1 %v324_v4  ;;  %v98_v38 = vmul.f32 %v501_v30, %v65_v28  ;;  %v99_v39 = vmul.f32 %v501_v30, %v66_v29  ;;  %vm85_vm2 = vcmp.gt.f32.partialorder %v69_v31, 0.0  ;;  %v102_v41 = vmul.f32 %v501_v30, %v69_v31 }
   0xb   :  { %420 = vmatpush.bf16.msra.mxu2 %v324_v4  ;;  %421 = vmatpush.bf16.msra.mxu3 %v324_v4  ;;  %v103_v42 = vmul.f32 %v501_v30, %v70_v32  ;;  %v106_v43 = vmul.f32 %v501_v30, %v73_v33  ;;  %vm86_vm3 = vcmp.gt.f32.partialorder %v70_v32, 0.0  ;;  %vm89_vm4 = vcmp.gt.f32.partialorder %v73_v33, 0.0 }
   0xc   :  { %v107_v45 = vmul.f32 %v501_v30, %v74_v35  ;;  %v110_v46 = vmul.f32 %v501_v30, %v77_v36  ;;  %vm90_vm5 = vcmp.gt.f32.partialorder %v74_v35, 0.0  ;;  %vm93_vm6 = vcmp.gt.f32.partialorder %v77_v36, 0.0 }
   0xd   :  { %v111_v48 = vmul.f32 %v501_v30, %v78_v37  ;;  %v114_v51 = vsel %vm81_vm0, %v65_v28, %v98_v38  ;;  %v115_v52 = vsel %vm82_vm1, %v66_v29, %v99_v39  ;;  %vm94_vm7 = vcmp.gt.f32.partialorder %v78_v37, 0.0 }
   0xe   :  { %205 = vmatpush.bf16.msra.mxu0 %v323_v14  ;;  %422 = vmatpush.bf16.msra.mxu1 %v323_v14  ;;  %v118_v55 = vsel %vm85_vm2, %v69_v31, %v102_v41  ;;  %v119_v56 = vsel %vm86_vm3, %v70_v32, %v103_v42  ;;  %v122_v57 = vsel %vm89_vm4, %v73_v33, %v106_v43  ;;  %v341_v58 = vunpack.c.l.bf16 %v401_v47 }
   0xf   :  { %423 = vmatpush.bf16.msra.mxu2 %v323_v14  ;;  %424 = vmatpush.bf16.msra.mxu3 %v323_v14  ;;  %v123_v60 = vsel %vm90_vm5, %v74_v35, %v107_v45  ;;  %v126_v61 = vsel %vm93_vm6, %v77_v36, %v110_v46  ;;  %v342_v62 = vunpack.c.h.bf16 %v401_v47  ;;  %v349_v63 = vunpack.c.l.bf16 %v403_v50 }
  0x10   :  { %v127_v0 = vsel %vm94_vm7, %v78_v37, %v111_v48  ;;  %v350_v1 = vunpack.c.h.bf16 %v403_v50  ;;  %v357_v2 = vunpack.c.l.bf16 %v405_v54  ;;  %v358_v3 = vunpack.c.h.bf16 %v405_v54 }
  0x11   :  { %v130_v4 = vpack.c.bf16 %v115_v52, %v114_v51  ;;  %v132_v5 = vpack.c.bf16 %v119_v56, %v118_v55  ;;  %v134_v6 = vpack.c.bf16 %v123_v60, %v122_v57  ;;  %v50_v7 = vmul.f32 %v333_v49, %v481_v10 }
  0x12   :  { %206 = vmatpush.bf16.msra.mxu0 %v322_v24  ;;  %425 = vmatpush.bf16.msra.mxu1 %v322_v24  ;;  %v51_v8 = vmul.f32 %v334_v53, %v481_v10  ;;  %v54_v9 = vmul.f32 %v341_v58, %v481_v10  ;;  %v136_v11 = vpack.c.bf16 %v127_v0, %v126_v61 }
  0x13   :  { %426 = vmatpush.bf16.msra.mxu2 %v322_v24  ;;  %427 = vmatpush.bf16.msra.mxu3 %v322_v24  ;;  %v55_v12 = vmul.f32 %v342_v62, %v481_v10  ;;  %v58_v13 = vmul.f32 %v349_v63, %v481_v10  ;;  %v59_v14 = vmul.f32 %v350_v1, %v481_v10 }
  0x14   :  { %v62_v15 = vmul.f32 %v357_v2, %v481_v10  ;;  %v63_v16 = vmul.f32 %v358_v3, %v481_v10  ;;  %v67_v17 = vadd.f32 %v488_v20, %v50_v7  ;;  %v68_v18 = vadd.f32 %v488_v20, %v51_v8 }
  0x15   :  { %v71_v19 = vadd.f32 %v488_v20, %v54_v9  ;;  %v72_v21 = vadd.f32 %v488_v20, %v55_v12  ;;  %v75_v22 = vadd.f32 %v488_v20, %v58_v13  ;;  %v76_v23 = vadd.f32 %v488_v20, %v59_v14 }
  0x16   :  { %207 = vmatpush.bf16.msra.mxu0 %v321_v34  ;;  %428 = vmatpush.bf16.msra.mxu1 %v321_v34  ;;  %v79_v24 = vadd.f32 %v488_v20, %v62_v15  ;;  %v80_v10 = vadd.f32 %v488_v20, %v63_v16  ;;  %vm83_vm8 = vcmp.gt.f32.partialorder %v67_v17, 0.0  ;;  %vm84_vm9 = vcmp.gt.f32.partialorder %v68_v18, 0.0 }
  0x17   :  { %429 = vmatpush.bf16.msra.mxu2 %v321_v34  ;;  %430 = vmatpush.bf16.msra.mxu3 %v321_v34  ;;  %v100_v25 = vmul.f32 %v501_v30, %v67_v17  ;;  %v101_v26 = vmul.f32 %v501_v30, %v68_v18  ;;  %vm87_vm10 = vcmp.gt.f32.partialorder %v71_v19, 0.0  ;;  %vm88_vm11 = vcmp.gt.f32.partialorder %v72_v21, 0.0 }
  0x18   :  { %v104_v27 = vmul.f32 %v501_v30, %v71_v19  ;;  %v105_v28 = vmul.f32 %v501_v30, %v72_v21  ;;  %v108_v29 = vmul.f32 %v501_v30, %v75_v22  ;;  %v109_v31 = vmul.f32 %v501_v30, %v76_v23 }
  0x19   :  { %v112_v32 = vmul.f32 %v501_v30, %v79_v24  ;;  %v113_v20 = vmul.f32 %v501_v30, %v80_v10  ;;  %vm91_vm12 = vcmp.gt.f32.partialorder %v75_v22, 0.0  ;;  %vm92_vm13 = vcmp.gt.f32.partialorder %v76_v23, 0.0 }
  0x1a   :  { %208 = vmatpush.bf16.msra.mxu0 %v320_v44  ;;  %431 = vmatpush.bf16.msra.mxu1 %v320_v44  ;;  %vm95_vm14 = vcmp.gt.f32.partialorder %v79_v24, 0.0  ;;  %vm96_vm15 = vcmp.gt.f32.partialorder %v80_v10, 0.0  ;;  %v116_v33 = vsel %vm83_vm8, %v67_v17, %v100_v25  ;;  %v117_v34 = vsel %vm84_vm9, %v68_v18, %v101_v26 }
  0x1b   :  { %432 = vmatpush.bf16.msra.mxu2 %v320_v44  ;;  %433 = vmatpush.bf16.msra.mxu3 %v320_v44  ;;  %v120_v35 = vsel %vm87_vm10, %v71_v19, %v104_v27  ;;  %v121_v36 = vsel %vm88_vm11, %v72_v21, %v105_v28  ;;  %v124_v37 = vsel %vm91_vm12, %v75_v22, %v108_v29 }
  0x1c   :  { %v125_v38 = vsel %vm92_vm13, %v76_v23, %v109_v31  ;;  %v128_v39 = vsel %vm95_vm14, %v79_v24, %v112_v32  ;;  %v129_v40 = vsel %vm96_vm15, %v80_v10, %v113_v20  ;;  %v131_v41 = vpack.c.bf16 %v117_v34, %v116_v33 }
  0x1d   :  { %v133_v42 = vpack.c.bf16 %v121_v36, %v120_v35  ;;  %v135_v43 = vpack.c.bf16 %v125_v38, %v124_v37  ;;  %v137_v44 = vpack.c.bf16 %v129_v40, %v128_v39 }
  0x1e   :  { %209 = vmatpush.bf16.msra.mxu0 %v319_v59  ;;  %434 = vmatpush.bf16.msra.mxu1 %v319_v59 }
  0x1f   :  { %435 = vmatpush.bf16.msra.mxu2 %v319_v59  ;;  %436 = vmatpush.bf16.msra.mxu3 %v319_v59 }
  0x21   :  { %210 = vmatmul.bf16.vlgmr.msra.gmra.mxu0 %v130_v4  ;;  %220 = vmatmul.bf16.vlgmr.msra.gmra.mxu1 %v132_v5 }
  0x22   :  { %230 = vmatmul.bf16.vlgmr.msra.gmra.mxu2 %v134_v6  ;;  %240 = vmatmul.bf16.vlgmr.msra.gmra.mxu3 %v136_v11 }
  0x31   :  { %215 = vmatmul.bf16.gmra.mxu0 %v131_v41  ;;  %225 = vmatmul.bf16.gmra.mxu1 %v133_v42 }
  0x32   :  { %235 = vmatmul.bf16.gmra.mxu2 %v135_v43  ;;  %245 = vmatmul.bf16.gmra.mxu3 %v137_v44 }
  0x9e   :  { %v211_v30 = vpop.f32.mrf.mxu0  ;;  %v221_v45 = vpop.f32.mrf.mxu1 }
  0xa5   :  { %v231_v46 = vpop.f32.mrf.mxu2  ;;  %v241_v47 = vpop.f32.mrf.mxu3 }
  0xa6   :  { %v213_v48 = vpop.f32.mrf.mxu0  ;;  %v223_v49 = vpop.f32.mrf.mxu1 }
  0xa7   :  { %v362_v50 = vpack.c.bf16 %v213_v48, %v211_v30  ;;  %v372_v51 = vpack.c.bf16 %v223_v49, %v221_v45 }
  0xa9   :  { %363 = vst [vmem:[%s599_s3] sm:$0xff] %v362_v50  }
  0xaa   :  { %407 = vst [vmem:[%s599_s3 + $0x10] sm:$0xff] %v372_v51  }
  0xad   :  { %v233_v52 = vpop.f32.mrf.mxu2  ;;  %v243_v53 = vpop.f32.mrf.mxu3 }
  0xae   :  { %v382_v54 = vpack.c.bf16 %v233_v52, %v231_v46  ;;  %v392_v55 = vpack.c.bf16 %v243_v53, %v241_v47  ;;  %v216_v56 = vpop.f32.mrf.mxu0  ;;  %v226_v57 = vpop.f32.mrf.mxu1 }
  0xb0   :  { %409 = vst [vmem:[%s599_s3 + $0x20] sm:$0xff] %v382_v54  }
  0xb1   :  { %411 = vst [vmem:[%s599_s3 + $0x30] sm:$0xff] %v392_v55  }
  0xb5   :  { %v236_v58 = vpop.f32.mrf.mxu2  ;;  %v246_v59 = vpop.f32.mrf.mxu3 }
  0xb6   :  { %v218_v60 = vpop.f32.mrf.mxu0  ;;  %v228_v61 = vpop.f32.mrf.mxu1 }
  0xb7   :  { %v367_v62 = vpack.c.bf16 %v218_v60, %v216_v56  ;;  %v377_v63 = vpack.c.bf16 %v228_v61, %v226_v57 }
  0xb9   :  { %406 = vst [vmem:[%s599_s3 + $0x8] sm:$0xff] %v367_v62  }
  0xba   :  { %408 = vst [vmem:[%s599_s3 + $0x18] sm:$0xff] %v377_v63  }
  0xbd   :  { %v238_v0 = vpop.f32.mrf.mxu2  ;;  %v248_v1 = vpop.f32.mrf.mxu3 }
  0xbe   :  { %v387_v2 = vpack.c.bf16 %v238_v0, %v236_v58  ;;  %v397_v3 = vpack.c.bf16 %v248_v1, %v246_v59 }
  0xc0   :  { %410 = vst [vmem:[%s599_s3 + $0x28] sm:$0xff] %v387_v2  }
  0xc1   :  { %412 = vst [vmem:[%s599_s3 + $0x38] sm:$0xff] %v397_v3  }

// kernel: encoder_forward.7
= control target key start
LH: loop header
LB: loop body
LE: loop exit
PB: predicated region body
PF: predicated region fallthrough
CT: control target
= control target key end

     0   :  { %s330_s0 = inlined_call_operand.vmem [shape: bf16[128,128], index: 0, kind: input, shape index: {}]   ;;  %s331_s1 = inlined_call_operand.vmem [shape: f32[8,128], index: 1, kind: input, shape index: {}]   ;;  %s332_s2 = inlined_call_operand.vmem [shape: f32[128,128], index: 2, kind: output, shape index: {}]  }
   0x1   :  { %v11_v0 = vld [vmem:[%s331_s1] sm:$0xff]  ;;  %v179_v2 = vld [vmem:[%s330_s0 + $0x8] sm:$0xff]   ;;  %v180_v7 = vld [vmem:[%s330_s0 + $0x10] sm:$0xff]  }
   0x2   :  { %v148_v1 = vld [vmem:[%s330_s0] sm:$0xff]   ;;  %v210_v4 = vperm.slane %v11_v0, 0  ;;  %v212_v5 = vperm.slane %v11_v0, 1  ;;  %v214_v6 = vperm.slane %v11_v0, 2  ;;  %v181_v8 = vld [vmem:[%s330_s0 + $0x18] sm:$0xff]   ;;  %v153_v10 = vunpack.c.l.bf16 %v179_v2  ;;  %v183_v40 = vld [vmem:[%s330_s0 + $0x28] sm:$0xff]  }
   0x3   :  { %v149_v3 = vunpack.c.l.bf16 %v148_v1  ;;  %v150_v9 = vunpack.c.h.bf16 %v148_v1  ;;  %v154_v11 = vunpack.c.h.bf16 %v179_v2  ;;  %v157_v12 = vunpack.c.l.bf16 %v180_v7  ;;  %v182_v36 = vld [vmem:[%s330_s0 + $0x20] sm:$0xff]   ;;  %v184_v48 = vld [vmem:[%s330_s0 + $0x30] sm:$0xff]   ;;  %v185_v53 = vld [vmem:[%s330_s0 + $0x38] sm:$0xff]  }
   0x4   :  { %v158_v14 = vunpack.c.h.bf16 %v180_v7  ;;  %v161_v15 = vunpack.c.l.bf16 %v181_v8  ;;  %v162_v16 = vunpack.c.h.bf16 %v181_v8  ;;  %v47_v18 = vmul.f32 %v153_v10, %v210_v4 }
   0x5   :  { %v45_v13 = vmul.f32 %v149_v3, %v210_v4  ;;  %v46_v17 = vmul.f32 %v150_v9, %v210_v4  ;;  %v48_v19 = vmul.f32 %v154_v11, %v210_v4  ;;  %v49_v20 = vmul.f32 %v157_v12, %v210_v4 }
   0x6   :  { %v50_v22 = vmul.f32 %v158_v14, %v210_v4  ;;  %v51_v23 = vmul.f32 %v161_v15, %v210_v4  ;;  %v52_v24 = vmul.f32 %v162_v16, %v210_v4  ;;  %v64_v26 = vadd.f32 %v212_v5, %v47_v18 }
   0x7   :  { %v62_v21 = vadd.f32 %v212_v5, %v45_v13  ;;  %v63_v25 = vadd.f32 %v212_v5, %v46_v17  ;;  %v65_v27 = vadd.f32 %v212_v5, %v48_v19  ;;  %v66_v28 = vadd.f32 %v212_v5, %v49_v20 }
   0x8   :  { %v67_v30 = vadd.f32 %v212_v5, %v50_v22  ;;  %v68_v31 = vadd.f32 %v212_v5, %v51_v23  ;;  %vm80_vm2 = vcmp.gt.f32.partialorder %v64_v26, 0.0  ;;  %v97_v33 = vmul.f32 %v214_v6, %v64_v26 }
   0x9   :  { %vm78_vm0 = vcmp.gt.f32.partialorder %v62_v21, 0.0  ;;  %v95_v29 = vmul.f32 %v214_v6, %v62_v21  ;;  %vm79_vm1 = vcmp.gt.f32.partialorder %v63_v25, 0.0  ;;  %v96_v32 = vmul.f32 %v214_v6, %v63_v25 }
   0xa   :  { %vm81_vm3 = vcmp.gt.f32.partialorder %v65_v27, 0.0  ;;  %v98_v35 = vmul.f32 %v214_v6, %v65_v27  ;;  %vm82_vm4 = vcmp.gt.f32.partialorder %v66_v28, 0.0  ;;  %v113_v38 = vsel %vm80_vm2, %v64_v26, %v97_v33 }
   0xb   :  { %v111_v34 = vsel %vm78_vm0, %v62_v21, %v95_v29  ;;  %v112_v37 = vsel %vm79_vm1, %v63_v25, %v96_v32  ;;  %v99_v39 = vmul.f32 %v214_v6, %v66_v28  ;;  %vm83_vm5 = vcmp.gt.f32.partialorder %v67_v30, 0.0  ;;  %129 = vst [vmem:[%s332_s2 + $0x10] sm:$0xff] %v113_v38 }
   0xc   :  { %127 = vst [vmem:[%s332_s2] sm:$0xff] %v111_v34  ;;  %v114_v41 = vsel %vm81_vm3, %v65_v27, %v98_v35  ;;  %v100_v42 = vmul.f32 %v214_v6, %v67_v30  ;;  %vm84_vm6 = vcmp.gt.f32.partialorder %v68_v31, 0.0  ;;  %v101_v43 = vmul.f32 %v214_v6, %v68_v31 }
   0xd   :  { %128 = vst [vmem:[%s332_s2 + $0x8] sm:$0xff] %v112_v37  ;;  %v115_v44 = vsel %vm82_vm4, %v66_v28, %v99_v39  ;;  %v69_v45 = vadd.f32 %v212_v5, %v52_v24  ;;  %v165_v46 = vunpack.c.l.bf16 %v182_v36  ;;  %v166_v47 = vunpack.c.h.bf16 %v182_v36 }
   0xe   :  { %130 = vst [vmem:[%s332_s2 + $0x18] sm:$0xff] %v114_v41  ;;  %v116_v49 = vsel %vm83_vm5, %v67_v30, %v100_v42  ;;  %v117_v50 = vsel %vm84_vm6, %v68_v31, %v101_v43  ;;  %v169_v51 = vunpack.c.l.bf16 %v183_v40  ;;  %v170_v52 = vunpack.c.h.bf16 %v183_v40 }
   0xf   :  { %131 = vst [vmem:[%s332_s2 + $0x20] sm:$0xff] %v115_v44  ;;  %vm85_vm7 = vcmp.gt.f32.partialorder %v69_v45, 0.0  ;;  %v102_v54 = vmul.f32 %v214_v6, %v69_v45  ;;  %v53_v55 = vmul.f32 %v165_v46, %v210_v4  ;;  %v54_v56 = vmul.f32 %v166_v47, %v210_v4 }
  0x10   :  { %132 = vst [vmem:[%s332_s2 + $0x28] sm:$0xff] %v116_v49  ;;  %v55_v57 = vmul.f32 %v169_v51, %v210_v4  ;;  %v56_v58 = vmul.f32 %v170_v52, %v210_v4  ;;  %v173_v59 = vunpack.c.l.bf16 %v184_v48  ;;  %v174_v60 = vunpack.c.h.bf16 %v184_v48 }
  0x11   :  { %133 = vst [vmem:[%s332_s2 + $0x30] sm:$0xff] %v117_v50  ;;  %v118_v61 = vsel %vm85_vm7, %v69_v45, %v102_v54  ;;  %v70_v62 = vadd.f32 %v212_v5, %v53_v55  ;;  %v71_v63 = vadd.f32 %v212_v5, %v54_v56  ;;  %v177_v0 = vunpack.c.l.bf16 %v185_v53 }
  0x12   :  { %134 = vst [vmem:[%s332_s2 + $0x38] sm:$0xff] %v118_v61  ;;  %v72_v1 = vadd.f32 %v212_v5, %v55_v57  ;;  %v73_v2 = vadd.f32 %v212_v5, %v56_v58  ;;  %v57_v3 = vmul.f32 %v173_v59, %v210_v4  ;;  %v58_v7 = vmul.f32 %v174_v60, %v210_v4 }
  0x13   :  { %vm86_vm8 = vcmp.gt.f32.partialorder %v70_v62, 0.0  ;;  %v103_v8 = vmul.f32 %v214_v6, %v70_v62  ;;  %vm87_vm9 = vcmp.gt.f32.partialorder %v71_v63, 0.0  ;;  %v104_v9 = vmul.f32 %v214_v6, %v71_v63 }
  0x14   :  { %vm88_vm10 = vcmp.gt.f32.partialorder %v72_v1, 0.0  ;;  %v105_v10 = vmul.f32 %v214_v6, %v72_v1  ;;  %vm89_vm11 = vcmp.gt.f32.partialorder %v73_v2, 0.0  ;;  %v106_v11 = vmul.f32 %v214_v6, %v73_v2 }
  0x15   :  { %v119_v12 = vsel %vm86_vm8, %v70_v62, %v103_v8  ;;  %v120_v13 = vsel %vm87_vm9, %v71_v63, %v104_v9  ;;  %v74_v14 = vadd.f32 %v212_v5, %v57_v3  ;;  %v75_v15 = vadd.f32 %v212_v5, %v58_v7 }
  0x16   :  { %135 = vst [vmem:[%s332_s2 + $0x40] sm:$0xff] %v119_v12  ;;  %v121_v16 = vsel %vm88_vm10, %v72_v1, %v105_v10  ;;  %v122_v17 = vsel %vm89_vm11, %v73_v2, %v106_v11  ;;  %v59_v18 = vmul.f32 %v177_v0, %v210_v4  ;;  %v178_v19 = vunpack.c.h.bf16 %v185_v53 }
  0x17   :  { %136 = vst [vmem:[%s332_s2 + $0x48] sm:$0xff] %v120_v13  ;;  %vm90_vm12 = vcmp.gt.f32.partialorder %v74_v14, 0.0  ;;  %v107_v20 = vmul.f32 %v214_v6, %v74_v14  ;;  %vm91_vm13 = vcmp.gt.f32.partialorder %v75_v15, 0.0  ;;  %v108_v21 = vmul.f32 %v214_v6, %v75_v15 }
  0x18   :  { %137 = vst [vmem:[%s332_s2 + $0x50] sm:$0xff] %v121_v16  ;;  %v76_v22 = vadd.f32 %v212_v5, %v59_v18  ;;  %v60_v23 = vmul.f32 %v178_v19, %v210_v4 }
  0x19   :  { %138 = vst [vmem:[%s332_s2 + $0x58] sm:$0xff] %v122_v17  ;;  %v123_v24 = vsel %vm90_vm12, %v74_v14, %v107_v20  ;;  %v124_v25 = vsel %vm91_vm13, %v75_v15, %v108_v21 }
  0x1a   :  { %139 = vst [vmem:[%s332_s2 + $0x60] sm:$0xff] %v123_v24  ;;  %vm92_vm14 = vcmp.gt.f32.partialorder %v76_v22, 0.0  ;;  %v109_v26 = vmul.f32 %v214_v6, %v76_v22  ;;  %v77_v27 = vadd.f32 %v212_v5, %v60_v23 }
  0x1b   :  { %140 = vst [vmem:[%s332_s2 + $0x68] sm:$0xff] %v124_v25 }
  0x1c   :  { %v125_v4 = vsel %vm92_vm14, %v76_v22, %v109_v26  ;;  %vm93_vm15 = vcmp.gt.f32.partialorder %v77_v27, 0.0  ;;  %v110_v28 = vmul.f32 %v214_v6, %v77_v27 }
  0x1d   :  { %141 = vst [vmem:[%s332_s2 + $0x70] sm:$0xff] %v125_v4 }
  0x1e   :  { %v126_v29 = vsel %vm93_vm15, %v77_v27, %v110_v28 }
  0x1f   :  { %142 = vst [vmem:[%s332_s2 + $0x78] sm:$0xff] %v126_v29 }

</bundles_post_ra>
